<compile_context>
chip_gen: v7x
topology: tpu7x:2x2x1
jax: 0.10.0
libtpu: 0.0.40
codegen_flags: <defaults>
</compile_context>

<pallas_src>
import functools

import jax
import jax.numpy as jnp
from jax.experimental import pallas as pl
from jax.experimental.pallas import tpu as pltpu

LANE = 128     # vreg lane width (last dim)
SUBLANE = 8    # vreg sublane width (second-to-last dim, f32)


def _round_up(n, m):
    return (n + m - 1) // m * m


def _pad2d(a, rows, cols):
    pr, pc = rows - a.shape[0], cols - a.shape[1]
    if pr == 0 and pc == 0:
        return a
    return jnp.pad(a, ((0, pr), (0, pc)))


# --------------------------------------------------------------------------
# Kernel
# --------------------------------------------------------------------------
def _ae_kernel(x_ref,
               w1_ref, b1_ref, w2_ref, b2_ref,      # encoder params (bf16 W, f32 b)
               w3_ref, b3_ref, w4_ref, b4_ref,      # decoder params (bf16 W, f32 b)
               rep_ref, xhat_ref):
    bf16 = jnp.bfloat16
    x = x_ref[...]                                   # [TB, Dp] bf16

    # ---- encoder ----
    h1 = jnp.dot(x, w1_ref[...], preferred_element_type=jnp.float32) + b1_ref[...]
    h1 = jnp.maximum(h1, 0.0)
    rep = jnp.dot(h1.astype(bf16), w2_ref[...],
                  preferred_element_type=jnp.float32) + b2_ref[...]
    rep = jnp.maximum(rep, 0.0)

    # ---- decoder ----
    h2 = jnp.dot(rep.astype(bf16), w3_ref[...],
                 preferred_element_type=jnp.float32) + b3_ref[...]
    h2 = jnp.maximum(h2, 0.0)
    logits = jnp.dot(h2.astype(bf16), w4_ref[...],
                     preferred_element_type=jnp.float32) + b4_ref[...]
    xhat = jax.nn.sigmoid(logits)

    rep_ref[...] = rep.astype(rep_ref.dtype)         # lane-dense bf16 [TB, Lp] store
    xhat_ref[...] = xhat.astype(xhat_ref.dtype)      # lane-dense bf16 [TB, Dp] store


# --------------------------------------------------------------------------
# One-shot preparation (run at load time / in the data pipeline, NOT per call)
# --------------------------------------------------------------------------
def prepare_params(params):
    """Pad feature dims to multiples of 128 and cast weights to bf16, once.

    params = (w1, b1, w2, b2, w3, b3, w4, b4), weights stored (in, out).
    Zero padding keeps the math exact (padded K rows / columns are 0).
    """
    w1, b1, w2, b2, w3, b3, w4, b4 = params
    D, H = w1.shape
    L = w2.shape[1]
    Dp, Hp, Lp = _round_up(D, LANE), _round_up(H, LANE), _round_up(L, LANE)
    prepped = (
        _pad2d(w1, Dp, Hp).astype(jnp.bfloat16), _pad2d(b1, 1, Hp).astype(jnp.float32),
        _pad2d(w2, Hp, Lp).astype(jnp.bfloat16), _pad2d(b2, 1, Lp).astype(jnp.float32),
        _pad2d(w3, Lp, Hp).astype(jnp.bfloat16), _pad2d(b3, 1, Hp).astype(jnp.float32),
        _pad2d(w4, Hp, Dp).astype(jnp.bfloat16), _pad2d(b4, 1, Dp).astype(jnp.float32),
    )
    dims = dict(D=D, H=H, L=L, Dp=Dp, Hp=Hp, Lp=Lp)
    return prepped, dims


def prepare_input(x, dims):
    """Pad x's feature dim to Dp and cast to bf16 (one-hot {0,1} is exact)."""
    B = x.shape[0]
    return _pad2d(x, B, dims["Dp"]).astype(jnp.bfloat16)


def _choose_batch_tile(B, Dp, Hp, Lp, batch_tile):
    """VMEM-budgeted batch tile.

    Per-row bytes: bf16 x (double-buffered) + bf16 rep/x_hat outputs
    (double-buffered) + f32 intermediates.  Weights are single-buffered.
    14 MiB budget keeps the footprint inside v5e's 16 MiB default scoped VMEM
    (and well inside v7x's 64 MiB/TC).
    """
    weight_bytes = 2 * (Dp * Hp + 2 * Hp * Lp + Hp * Dp) + 4 * (2 * Hp + Lp + Dp)
    per_row = 4 * (2 * Dp + Lp) + 4 * (2 * Hp + Lp + Dp)
    budget = 14 << 20
    cap = max(SUBLANE, (budget - weight_bytes) // max(per_row, 1))
    tb = max(SUBLANE, min(batch_tile, cap) // SUBLANE * SUBLANE)

    b8 = _round_up(B, SUBLANE)
    if b8 <= tb:
        # Whole batch fits in one tile: if the batch is big enough, split into
        # two >=128-row tiles so the "parallel" axis shards across v7x's 2 TCs.
        tb = _round_up(-(-b8 // 2), LANE) if b8 >= 2 * LANE else b8
    elif tb >= LANE:
        tb = tb // LANE * LANE   # full-128 MXU M-dimension passes
    return tb


# --------------------------------------------------------------------------
# Fast path: already-prepared bf16 padded input, padded bf16 outputs
# --------------------------------------------------------------------------
@functools.partial(jax.jit, static_argnames=("batch_tile",))
def forward_padded(xp, prepped, *, batch_tile=512):
    """xp: bf16 [B, Dp] (feature-padded). Returns padded bf16
    (rep_p [Bp, Lp], xhat_p [Bp, Dp]) with Bp = B rounded up to the batch tile.
    """
    w1p, b1p, w2p, b2p, w3p, b3p, w4p, b4p = prepped
    B, Dp = xp.shape
    Hp = w1p.shape[1]
    Lp = w2p.shape[1]

    TB = _choose_batch_tile(B, Dp, Hp, Lp, batch_tile)
    Bp = _round_up(B, TB)
    if Bp != B:
        xp = jnp.pad(xp, ((0, Bp - B), (0, 0)))

    def const(shape):
        # Same block every grid step -> stays VMEM-resident; single-buffered
        # since a never-changing block needs no prefetch overlap.
        return pl.BlockSpec(shape, lambda i: (0, 0),
                            pipeline_mode=pl.Buffered(buffer_count=1))

    # Explicit scoped-VMEM limit from the estimated footprint (2x headroom).
    weight_bytes = 2 * (Dp * Hp + 2 * Hp * Lp + Hp * Dp) + 4 * (2 * Hp + Lp + Dp)
    act_bytes = TB * (4 * (2 * Dp + Lp) + 4 * (2 * Hp + Lp + Dp))
    vmem_limit = int(min(64 << 20, max(2 * (weight_bytes + act_bytes), 16 << 20)))

    rep_p, xhat_p = pl.pallas_call(
        _ae_kernel,
        out_shape=(
            jax.ShapeDtypeStruct((Bp, Lp), jnp.bfloat16),
            jax.ShapeDtypeStruct((Bp, Dp), jnp.bfloat16),
        ),
        grid_spec=pltpu.PrefetchScalarGridSpec(
            num_scalar_prefetch=0,
            grid=(Bp // TB,),
            in_specs=[
                pl.BlockSpec((TB, Dp), lambda i: (i, 0)),   # x, blocked on batch
                const((Dp, Hp)), const((1, Hp)),            # encoder layer 1
                const((Hp, Lp)), const((1, Lp)),            # encoder layer 2
                const((Lp, Hp)), const((1, Hp)),            # decoder layer 1
                const((Hp, Dp)), const((1, Dp)),            # decoder layer 2
            ],
            out_specs=[
                pl.BlockSpec((TB, Lp), lambda i: (i, 0)),   # rep
                pl.BlockSpec((TB, Dp), lambda i: (i, 0)),   # x_hat
            ],
        ),
        compiler_params=pltpu.CompilerParams(
            dimension_semantics=("parallel",),              # batch tiles independent
            vmem_limit_bytes=vmem_limit,
        ),
    )(xp, w1p, b1p, w2p, b2p, w3p, b3p, w4p, b4p)

    return rep_p, xhat_p


def static_categorical_autoencoder(x, params, *, batch_tile=512):
    """Convenience wrapper matching the PyTorch module semantics exactly:
    f32 x [B, D] in, (rep [B, L], x_hat [B, D]) f32 out.

    Hot-path callers should instead call prepare_params()/prepare_input() once
    and use forward_padded() directly (padded bf16 outputs, no extra passes).
    """
    prepped, dims = prepare_params(params)
    xp = prepare_input(x, dims)
    rep_p, xhat_p = forward_padded(xp, prepped, batch_tile=batch_tile)
    B = x.shape[0]
    return (rep_p[:B, :dims["L"]].astype(jnp.float32),
            xhat_p[:B, :dims["D"]].astype(jnp.float32))


# --------------------------------------------------------------------------
# Params / reference
# --------------------------------------------------------------------------
def init_params(key, d_in, hidden, latent):
    """Deterministic parameter init (weights stored as (in, out))."""
    ks = jax.random.split(key, 8)

    def lin(kw, kb, fan_in, fan_out):
        scale = 1.0 / jnp.sqrt(jnp.float32(fan_in))
        w = jax.random.uniform(kw, (fan_in, fan_out), jnp.float32, -scale, scale)
        b = jax.random.uniform(kb, (1, fan_out), jnp.float32, -scale, scale)
        return w, b

    w1, b1 = lin(ks[0], ks[1], d_in, hidden)    # encoder layer 1
    w2, b2 = lin(ks[2], ks[3], hidden, latent)  # encoder layer 2
    w3, b3 = lin(ks[4], ks[5], latent, hidden)  # decoder layer 1
    w4, b4 = lin(ks[6], ks[7], hidden, d_in)    # decoder layer 2
    return (w1, b1, w2, b2, w3, b3, w4, b4)


def reference_forward(x, params):
    """Pure-JAX f32 reference (matches the PyTorch module semantics)."""
    w1, b1, w2, b2, w3, b3, w4, b4 = params
    h1 = jnp.maximum(x @ w1 + b1, 0.0)
    rep = jnp.maximum(h1 @ w2 + b2, 0.0)
    h2 = jnp.maximum(rep @ w3 + b3, 0.0)
    x_hat = jax.nn.sigmoid(h2 @ w4 + b4)
    return rep, x_hat


if __name__ == "__main__":
    key = jax.random.PRNGKey(0)
    k_x, k_p = jax.random.split(key)

    B, D, H, L = 8, 40, 32, 16   # batch, one-hot feature dim, hidden, latent
    # Synthetic "one-hot-ish" static categorical input (values in {0, 1}).
    x = (jax.random.uniform(k_x, (B, D), jnp.float32) > 0.7).astype(jnp.float32)
    params = init_params(k_p, D, H, L)

    # Hot-path usage: one-shot prep of params and input, padded bf16 outputs.
    prepped, dims = prepare_params(params)
    xp = prepare_input(x, dims)
    rep_p, xhat_p = forward_padded(xp, prepped)
    rep_p = jax.block_until_ready(rep_p)
    xhat_p = jax.block_until_ready(xhat_p)

    # Slice/cast only here, where the f32 reference comparison needs it.
    rep = rep_p[:B, :L].astype(jnp.float32)
    x_hat = xhat_p[:B, :D].astype(jnp.float32)

    # Correctness check against a pure-JAX f32 reference. The kernel uses bf16
    # weights/activations on the MXU with f32 accumulation and bf16 outputs,
    # so allow a small tolerance for the bf16 rounding.
    rep_ref, x_hat_ref = reference_forward(x, params)
    assert rep.shape == (B, L) and x_hat.shape == (B, D)
    assert jnp.allclose(rep, rep_ref, atol=2e-2, rtol=2e-2)
    assert jnp.allclose(x_hat, x_hat_ref, atol=2e-2, rtol=2e-2)

    print("KERNEL_OK")
</pallas_src>

<mosaic_0001>
module attributes {stable_mosaic.version = 11 : i64} {
  func.func @_ae_kernel(%arg0: i32, %arg1: memref<8x128xbf16, #tpu.memory_space<vmem>>, %arg2: memref<128x128xbf16, #tpu.memory_space<vmem>>, %arg3: memref<1x128xf32, #tpu.memory_space<vmem>>, %arg4: memref<128x128xbf16, #tpu.memory_space<vmem>>, %arg5: memref<1x128xf32, #tpu.memory_space<vmem>>, %arg6: memref<128x128xbf16, #tpu.memory_space<vmem>>, %arg7: memref<1x128xf32, #tpu.memory_space<vmem>>, %arg8: memref<128x128xbf16, #tpu.memory_space<vmem>>, %arg9: memref<1x128xf32, #tpu.memory_space<vmem>>, %arg10: memref<8x128xbf16, #tpu.memory_space<vmem>>, %arg11: memref<8x128xbf16, #tpu.memory_space<vmem>>) attributes {dimension_semantics = [#tpu.dimension_semantics<parallel>], iteration_bounds = array<i64: 1>, scalar_prefetch = 0 : i64, scratch_operands = 0 : i64, tpu.core_type = #tpu.core_type<tc>, window_params = [{transform_indices = @transform_0, window_bounds = array<i64: 8, 128>}, {pipeline_mode = #tpu.pipeline_mode<synchronous>, transform_indices = @transform_1, window_bounds = array<i64: 128, 128>}, {pipeline_mode = #tpu.pipeline_mode<synchronous>, transform_indices = @transform_2, window_bounds = array<i64: 1, 128>}, {pipeline_mode = #tpu.pipeline_mode<synchronous>, transform_indices = @transform_3, window_bounds = array<i64: 128, 128>}, {pipeline_mode = #tpu.pipeline_mode<synchronous>, transform_indices = @transform_4, window_bounds = array<i64: 1, 128>}, {pipeline_mode = #tpu.pipeline_mode<synchronous>, transform_indices = @transform_5, window_bounds = array<i64: 128, 128>}, {pipeline_mode = #tpu.pipeline_mode<synchronous>, transform_indices = @transform_6, window_bounds = array<i64: 1, 128>}, {pipeline_mode = #tpu.pipeline_mode<synchronous>, transform_indices = @transform_7, window_bounds = array<i64: 128, 128>}, {pipeline_mode = #tpu.pipeline_mode<synchronous>, transform_indices = @transform_8, window_bounds = array<i64: 1, 128>}, {transform_indices = @transform_9, window_bounds = array<i64: 8, 128>}, {transform_indices = @transform_10, window_bounds = array<i64: 8, 128>}]} {
    %c0 = arith.constant 0 : index
    %c0_0 = arith.constant 0 : index
    %0 = vector.load %arg1[%c0, %c0_0] : memref<8x128xbf16, #tpu.memory_space<vmem>>, vector<8x128xbf16>
    %c0_1 = arith.constant 0 : index
    %c0_2 = arith.constant 0 : index
    %1 = vector.load %arg2[%c0_1, %c0_2] : memref<128x128xbf16, #tpu.memory_space<vmem>>, vector<128x128xbf16>
    %cst = arith.constant dense<0.000000e+00> : vector<8x128xf32>
    %2 = tpu.matmul %0, %1, %cst {dimension_numbers = #tpu.dot_dimension_numbers<[1], [0], [0], [1], [0, 0, 1, 1], [], []>} : vector<8x128xbf16>, vector<128x128xbf16>, vector<8x128xf32> -> vector<8x128xf32>
    %c0_3 = arith.constant 0 : index
    %c0_4 = arith.constant 0 : index
    %3 = vector.load %arg3[%c0_3, %c0_4] : memref<1x128xf32, #tpu.memory_space<vmem>>, vector<1x128xf32>
    %4 = vector.broadcast %3 : vector<1x128xf32> to vector<8x128xf32>
    %5 = arith.addf %2, %4 : vector<8x128xf32>
    %cst_5 = arith.constant 0.000000e+00 : f32
    %6 = vector.broadcast %cst_5 : f32 to vector<8x128xf32>
    %7 = arith.maximumf %5, %6 : vector<8x128xf32>
    %8 = arith.truncf %7 : vector<8x128xf32> to vector<8x128xbf16>
    %c0_6 = arith.constant 0 : index
    %c0_7 = arith.constant 0 : index
    %9 = vector.load %arg4[%c0_6, %c0_7] : memref<128x128xbf16, #tpu.memory_space<vmem>>, vector<128x128xbf16>
    %cst_8 = arith.constant dense<0.000000e+00> : vector<8x128xf32>
    %10 = tpu.matmul %8, %9, %cst_8 {dimension_numbers = #tpu.dot_dimension_numbers<[1], [0], [0], [1], [0, 0, 1, 1], [], []>} : vector<8x128xbf16>, vector<128x128xbf16>, vector<8x128xf32> -> vector<8x128xf32>
    %c0_9 = arith.constant 0 : index
    %c0_10 = arith.constant 0 : index
    %11 = vector.load %arg5[%c0_9, %c0_10] : memref<1x128xf32, #tpu.memory_space<vmem>>, vector<1x128xf32>
    %12 = vector.broadcast %11 : vector<1x128xf32> to vector<8x128xf32>
    %13 = arith.addf %10, %12 : vector<8x128xf32>
    %cst_11 = arith.constant 0.000000e+00 : f32
    %14 = vector.broadcast %cst_11 : f32 to vector<8x128xf32>
    %15 = arith.maximumf %13, %14 : vector<8x128xf32>
    %16 = arith.truncf %15 : vector<8x128xf32> to vector<8x128xbf16>
    %c0_12 = arith.constant 0 : index
    %c0_13 = arith.constant 0 : index
    %17 = vector.load %arg6[%c0_12, %c0_13] : memref<128x128xbf16, #tpu.memory_space<vmem>>, vector<128x128xbf16>
    %cst_14 = arith.constant dense<0.000000e+00> : vector<8x128xf32>
    %18 = tpu.matmul %16, %17, %cst_14 {dimension_numbers = #tpu.dot_dimension_numbers<[1], [0], [0], [1], [0, 0, 1, 1], [], []>} : vector<8x128xbf16>, vector<128x128xbf16>, vector<8x128xf32> -> vector<8x128xf32>
    %c0_15 = arith.constant 0 : index
    %c0_16 = arith.constant 0 : index
    %19 = vector.load %arg7[%c0_15, %c0_16] : memref<1x128xf32, #tpu.memory_space<vmem>>, vector<1x128xf32>
    %20 = vector.broadcast %19 : vector<1x128xf32> to vector<8x128xf32>
    %21 = arith.addf %18, %20 : vector<8x128xf32>
    %cst_17 = arith.constant 0.000000e+00 : f32
    %22 = vector.broadcast %cst_17 : f32 to vector<8x128xf32>
    %23 = arith.maximumf %21, %22 : vector<8x128xf32>
    %24 = arith.truncf %23 : vector<8x128xf32> to vector<8x128xbf16>
    %c0_18 = arith.constant 0 : index
    %c0_19 = arith.constant 0 : index
    %25 = vector.load %arg8[%c0_18, %c0_19] : memref<128x128xbf16, #tpu.memory_space<vmem>>, vector<128x128xbf16>
    %cst_20 = arith.constant dense<0.000000e+00> : vector<8x128xf32>
    %26 = tpu.matmul %24, %25, %cst_20 {dimension_numbers = #tpu.dot_dimension_numbers<[1], [0], [0], [1], [0, 0, 1, 1], [], []>} : vector<8x128xbf16>, vector<128x128xbf16>, vector<8x128xf32> -> vector<8x128xf32>
    %c0_21 = arith.constant 0 : index
    %c0_22 = arith.constant 0 : index
    %27 = vector.load %arg9[%c0_21, %c0_22] : memref<1x128xf32, #tpu.memory_space<vmem>>, vector<1x128xf32>
    %28 = vector.broadcast %27 : vector<1x128xf32> to vector<8x128xf32>
    %29 = arith.addf %26, %28 : vector<8x128xf32>
    %30 = arith.negf %29 : vector<8x128xf32>
    %31 = math.exp %30 : vector<8x128xf32>
    %cst_23 = arith.constant 1.000000e+00 : f32
    %32 = vector.broadcast %cst_23 : f32 to vector<8x128xf32>
    %33 = arith.addf %32, %31 : vector<8x128xf32>
    %34 = arith.divf %32, %33 : vector<8x128xf32>
    %35 = arith.truncf %15 : vector<8x128xf32> to vector<8x128xbf16>
    %c0_24 = arith.constant 0 : index
    %c0_25 = arith.constant 0 : index
    %36 = vector.load %arg10[%c0_24, %c0_25] : memref<8x128xbf16, #tpu.memory_space<vmem>>, vector<8x128xbf16>
    tpu.vector_store %arg10[%c0_24, %c0_25], %35 {strides = array<i32>} : memref<8x128xbf16, #tpu.memory_space<vmem>>, vector<8x128xbf16>,
    %37 = arith.truncf %34 : vector<8x128xf32> to vector<8x128xbf16>
    %c0_26 = arith.constant 0 : index
    %c0_27 = arith.constant 0 : index
    %38 = vector.load %arg11[%c0_26, %c0_27] : memref<8x128xbf16, #tpu.memory_space<vmem>>, vector<8x128xbf16>
    tpu.vector_store %arg11[%c0_26, %c0_27], %37 {strides = array<i32>} : memref<8x128xbf16, #tpu.memory_space<vmem>>, vector<8x128xbf16>,
    return
  }
  func.func @transform_0(%arg0: i32) -> (i32, i32) {
    %c0_i32 = arith.constant 0 : i32
    %c0_i32_0 = arith.constant 0 : i32
    return %arg0, %c0_i32 : i32, i32
  }
  func.func @transform_1(%arg0: i32) -> (i32, i32) {
    %c0_i32 = arith.constant 0 : i32
    %c0_i32_0 = arith.constant 0 : i32
    %c0_i32_1 = arith.constant 0 : i32
    return %c0_i32, %c0_i32_0 : i32, i32
  }
  func.func @transform_2(%arg0: i32) -> (i32, i32) {
    %c0_i32 = arith.constant 0 : i32
    %c0_i32_0 = arith.constant 0 : i32
    %c0_i32_1 = arith.constant 0 : i32
    return %c0_i32, %c0_i32_0 : i32, i32
  }
  func.func @transform_3(%arg0: i32) -> (i32, i32) {
    %c0_i32 = arith.constant 0 : i32
    %c0_i32_0 = arith.constant 0 : i32
    %c0_i32_1 = arith.constant 0 : i32
    return %c0_i32, %c0_i32_0 : i32, i32
  }
  func.func @transform_4(%arg0: i32) -> (i32, i32) {
    %c0_i32 = arith.constant 0 : i32
    %c0_i32_0 = arith.constant 0 : i32
    %c0_i32_1 = arith.constant 0 : i32
    return %c0_i32, %c0_i32_0 : i32, i32
  }
  func.func @transform_5(%arg0: i32) -> (i32, i32) {
    %c0_i32 = arith.constant 0 : i32
    %c0_i32_0 = arith.constant 0 : i32
    %c0_i32_1 = arith.constant 0 : i32
    return %c0_i32, %c0_i32_0 : i32, i32
  }
  func.func @transform_6(%arg0: i32) -> (i32, i32) {
    %c0_i32 = arith.constant 0 : i32
    %c0_i32_0 = arith.constant 0 : i32
    %c0_i32_1 = arith.constant 0 : i32
    return %c0_i32, %c0_i32_0 : i32, i32
  }
  func.func @transform_7(%arg0: i32) -> (i32, i32) {
    %c0_i32 = arith.constant 0 : i32
    %c0_i32_0 = arith.constant 0 : i32
    %c0_i32_1 = arith.constant 0 : i32
    return %c0_i32, %c0_i32_0 : i32, i32
  }
  func.func @transform_8(%arg0: i32) -> (i32, i32) {
    %c0_i32 = arith.constant 0 : i32
    %c0_i32_0 = arith.constant 0 : i32
    %c0_i32_1 = arith.constant 0 : i32
    return %c0_i32, %c0_i32_0 : i32, i32
  }
  func.func @transform_9(%arg0: i32) -> (i32, i32) {
    %c0_i32 = arith.constant 0 : i32
    %c0_i32_0 = arith.constant 0 : i32
    return %arg0, %c0_i32 : i32, i32
  }
  func.func @transform_10(%arg0: i32) -> (i32, i32) {
    %c0_i32 = arith.constant 0 : i32
    %c0_i32_0 = arith.constant 0 : i32
    return %arg0, %c0_i32 : i32, i32
  }
}

</mosaic_0001>

<bundles_post_ra>
// kernel: forward_padded.1
= control target key start
LH: loop header
LB: loop body
LE: loop exit
PB: predicated region body
PF: predicated region fallthrough
CT: control target
= control target key end

     0   :  { %16 = vsyncpa [#allocation3], 0  ;;  %s1172_s0 = inlined_call_operand.hbm [shape: bf16[8,128], index: 0, kind: input, shape index: {}]   ;;  %s1173_s1 = inlined_call_operand.hbm [shape: bf16[128,128], index: 1, kind: input, shape index: {}]   ;;  %s1174_s2 = inlined_call_operand.vmem [shape: f32[1,128], index: 2, kind: input, shape index: {}]   ;;  %s1175_s3 = inlined_call_operand.hbm [shape: bf16[128,128], index: 3, kind: input, shape index: {}]   ;;  %s1176_s4 = inlined_call_operand.vmem [shape: f32[1,128], index: 4, kind: input, shape index: {}]   ;;  %s1177_s5 = inlined_call_operand.hbm [shape: bf16[128,128], index: 5, kind: input, shape index: {}]   ;;  %s1178_s6 = inlined_call_operand.vmem [shape: f32[1,128], index: 6, kind: input, shape index: {}]   ;;  %s1179_s7 = inlined_call_operand.hbm [shape: bf16[128,128], index: 7, kind: input, shape index: {}]   ;;  %s1180_s8 = inlined_call_operand.vmem [shape: f32[1,128], index: 8, kind: input, shape index: {}]   ;;  %s1181_s9 = inlined_call_operand.hbm [shape: bf16[8,128], index: 9, kind: output, shape index: {0}]   ;;  %s1182_s10 = inlined_call_operand.hbm [shape: bf16[8,128], index: 10, kind: output, shape index: {1}]  }
   0x1   :  { %17 = vsyncpa [#allocation6], 0 }
   0x2   :  { %18 = vsyncpa [#allocation9], 0 }
   0x3   :  { %19 = vsyncpa [#allocation4], 0 }
   0x4   :  { %20 = vsyncpa [#allocation13], 0  ;;  %s958_s13 = smov [#allocation5]   ;;  %s794_s17 = scalar_lea.hbm %s1173_s1, 1024 }
   0x5   :  { %s36_s14 = sshll.u32 %s958_s13, 4  ;;  %p795_p0 = scmp.ne.s32.totalorder %s1173_s1, %s794_s17  ;;  %s37_s14 = int_to_ptr.vmem [resolvable:$true] %s36_s14 }
   0x6   :  { %p798_p1 = scmp.lt.u32.totalorder %s794_s17, %s1173_s1 }
   0x8   :  { %p800_p2 = pnand %p798_p1, %p795_p0 }
   0xa   :  { %803 = shalt.err (!%p800_p2)
}
   0xb   :  { %s804_s22 = scalar_lea.vmem %s37_s14, 1024  ;;  %p809_p4 = scmp.lt.s32.totalorder %s37_s14, %s37_s14 }
   0xc   :  { %p805_p3 = scmp.ne.s32.totalorder %s37_s14, %s804_s22  ;;  %p810_p5 = scmp.lt.s32.totalorder %s804_s22, %s804_s22 }
   0xe   :  { %p811_p6 = por %p810_p5, %p809_p4 }
  0x10   :  { %p812_p7 = pnand %p811_p6, %p805_p3 }
  0x12   :  { %815 = shalt.err (!%p812_p7)
}
  0x13   :  { %s959_s23 = smov 64   ;;  %s960_s24 = smov 4  }
  0x14   :  { %42 = dma.hbm_to_vmem [thread:$0]  %s1173_s1, 1024, %s37_s14, [#allocation6], %s959_s23, %s959_s23, %s960_s24  }
  0x15   :  { %s961_s27 = smov [#allocation8]   ;;  %s962_s29 = smov [#allocation2]  }
  0x16   :  { %s64_s28 = sshll.u32 %s961_s27, 4  ;;  %s27_s30 = sshll.u32 %s962_s29, 4  ;;  %s65_s28 = int_to_ptr.vmem [resolvable:$true] %s64_s28  ;;  %s28_s30 = int_to_ptr.vmem [resolvable:$true] %s27_s30 }
  0x17   :  { %s816_s13 = scalar_lea.hbm %s1177_s5, 1024 }
  0x18   :  { %p817_p8 = scmp.ne.s32.totalorder %s1177_s5, %s816_s13  ;;  %p820_p9 = scmp.lt.u32.totalorder %s816_s13, %s1177_s5 }
  0x1a   :  { %p822_p10 = pnand %p820_p9, %p817_p8 }
  0x1c   :  { %825 = shalt.err (!%p822_p10)
}
  0x1d   :  { %s826_s1 = scalar_lea.vmem %s65_s28, 1024  ;;  %p831_p12 = scmp.lt.s32.totalorder %s65_s28, %s65_s28 }
  0x1e   :  { %p827_p11 = scmp.ne.s32.totalorder %s65_s28, %s826_s1  ;;  %p832_p13 = scmp.lt.s32.totalorder %s826_s1, %s826_s1 }
  0x20   :  { %p833_p0 = por %p832_p13, %p831_p12 }
  0x22   :  { %p834_p1 = pnand %p833_p0, %p827_p11 }
  0x24   :  { %837 = shalt.err (!%p834_p1)
}
  0x25   :  { %70 = dma.hbm_to_vmem [thread:$0]  %s1177_s5, 1024, %s65_s28, [#allocation9], %s959_s23, %s959_s23, %s960_s24  }
  0x26   :  { %s838_s22 = scalar_lea.hbm %s1172_s0, 64 }
  0x27   :  { %p839_p2 = scmp.ne.s32.totalorder %s1172_s0, %s838_s22  ;;  %p842_p3 = scmp.lt.u32.totalorder %s838_s22, %s1172_s0 }
  0x29   :  { %p844_p4 = pnand %p842_p3, %p839_p2 }
  0x2b   :  { %847 = shalt.err (!%p844_p4)
}
  0x2c   :  { %s848_s11 = scalar_lea.vmem %s28_s30, 64  ;;  %p853_p6 = scmp.lt.s32.totalorder %s28_s30, %s28_s30 }
  0x2d   :  { %p849_p5 = scmp.ne.s32.totalorder %s28_s30, %s848_s11  ;;  %p854_p7 = scmp.lt.s32.totalorder %s848_s11, %s848_s11 }
  0x2f   :  { %p855_p8 = por %p854_p7, %p853_p6 }
  0x31   :  { %p856_p9 = pnand %p855_p8, %p849_p5 }
  0x33   :  { %859 = shalt.err (!%p856_p9)
}
  0x34   :  { %30 = dma.hbm_to_vmem [thread:$0]  %s1172_s0, 64, %s28_s30, [#allocation3]  }
  0x35   :  { %s963_s12 = smov [#allocation7]   ;;  %s964_s15 = smov [#allocation10]  }
  0x36   :  { %s50_s13 = sshll.u32 %s963_s12, 4  ;;  %s78_s16 = sshll.u32 %s964_s15, 4  ;;  %s51_s13 = int_to_ptr.vmem [resolvable:$true] %s50_s13  ;;  %s79_s16 = int_to_ptr.vmem [resolvable:$true] %s78_s16 }
  0x37   :  { %s860_s1 = scalar_lea.hbm %s1175_s3, 1024 }
  0x38   :  { %p861_p10 = scmp.ne.s32.totalorder %s1175_s3, %s860_s1  ;;  %p864_p11 = scmp.lt.u32.totalorder %s860_s1, %s1175_s3 }
  0x3a   :  { %p866_p12 = pnand %p864_p11, %p861_p10 }
  0x3c   :  { %869 = shalt.err (!%p866_p12)
}
  0x3d   :  { %s870_s0 = scalar_lea.vmem %s51_s13, 1024  ;;  %p875_p0 = scmp.lt.s32.totalorder %s51_s13, %s51_s13 }
  0x3e   :  { %p871_p13 = scmp.ne.s32.totalorder %s51_s13, %s870_s0  ;;  %p876_p1 = scmp.lt.s32.totalorder %s870_s0, %s870_s0 }
  0x40   :  { %p877_p2 = por %p876_p1, %p875_p0 }
  0x42   :  { %p878_p3 = pnand %p877_p2, %p871_p13 }
  0x44   :  { %881 = shalt.err (!%p878_p3)
}
  0x45   :  { %56 = dma.hbm_to_vmem [thread:$0]  %s1175_s3, 1024, %s51_s13, [#allocation6], %s959_s23, %s959_s23, %s960_s24  }
  0x46   :  { %s882_s27 = scalar_lea.hbm %s1179_s7, 1024 }
  0x47   :  { %p883_p4 = scmp.ne.s32.totalorder %s1179_s7, %s882_s27  ;;  %p886_p5 = scmp.lt.u32.totalorder %s882_s27, %s1179_s7 }
  0x49   :  { %p888_p6 = pnand %p886_p5, %p883_p4 }
  0x4b   :  { %891 = shalt.err (!%p888_p6)
}
  0x4c   :  { %s892_s12 = scalar_lea.vmem %s79_s16, 1024  ;;  %p897_p8 = scmp.lt.s32.totalorder %s79_s16, %s79_s16 }
  0x4d   :  { %p893_p7 = scmp.ne.s32.totalorder %s79_s16, %s892_s12  ;;  %p898_p9 = scmp.lt.s32.totalorder %s892_s12, %s892_s12 }
  0x4f   :  { %p899_p10 = por %p898_p9, %p897_p8 }
  0x51   :  { %p900_p11 = pnand %p899_p10, %p893_p7 }
  0x53   :  { %903 = shalt.err (!%p900_p11)
}
  0x54   :  { %84 = dma.hbm_to_vmem [thread:$0]  %s1179_s7, 1024, %s79_s16, [#allocation9], %s959_s23, %s959_s23, %s960_s24  }
  0x55   :  { %948 = dma.done.wait [#allocation3], 64  }
  0x56   :  { %949 = vsyncadd [#allocation3], 4294967232 }
  0x57   :  { %950 = dma.done.wait [#allocation6], 2048  }
  0x58   :  { %951 = vsyncadd [#allocation6], 4294965248 }
  0x59   :  { %952 = dma.done.wait [#allocation9], 2048  }
  0x5a   :  { %953 = vsyncadd [#allocation9], 4294965248  ;;  %v965_v0 = vmov 0.0   ;;  %vm966_vm0 = vmmov 0   ;;  %v758_v1 = vld [vmem:[#allocation5] sm:$0xff]   ;;  %v759_v2 = vld [vmem:[#allocation5 + $0x8] sm:$0xff]  }
  0x5b   :  { %667 = vmatprep.subr.bf16.mxu0 %v965_v0  ;;  %683 = vmatprep.mubr.msk.bf16.mxu0 %vm966_vm0, %v965_v0  ;;  %v760_v3 = vld [vmem:[#allocation5 + $0x10] sm:$0xff]   ;;  %v766_v4 = vld [vmem:[#allocation7] sm:$0xff]   ;;  %v761_v5 = vld [vmem:[#allocation5 + $0x18] sm:$0xff]  }
  0x5c   :  { %687 = vmatprep.subr.bf16.mxu1 %v965_v0  ;;  %703 = vmatprep.mubr.msk.bf16.mxu1 %vm966_vm0, %v965_v0  ;;  %v767_v6 = vld [vmem:[#allocation7 + $0x8] sm:$0xff]   ;;  %v762_v7 = vld [vmem:[#allocation5 + $0x20] sm:$0xff]   ;;  %v768_v8 = vld [vmem:[#allocation7 + $0x10] sm:$0xff]  }
  0x5d   :  { %668 = vmatpush3.bf16.msra.mxu0 %v758_v1  ;;  %688 = vmatpush3.bf16.msra.mxu1 %v766_v4  ;;  %v763_v9 = vld [vmem:[#allocation5 + $0x28] sm:$0xff]   ;;  %v769_v10 = vld [vmem:[#allocation7 + $0x18] sm:$0xff]   ;;  %v764_v11 = vld [vmem:[#allocation5 + $0x30] sm:$0xff]  }
  0x5e   :  { %669 = vmatprep.subr.bf16.mxu0 %v965_v0  ;;  %689 = vmatprep.subr.bf16.mxu1 %v965_v0  ;;  %v770_v12 = vld [vmem:[#allocation7 + $0x20] sm:$0xff]   ;;  %v765_v13 = vld [vmem:[#allocation5 + $0x38] sm:$0xff]   ;;  %v771_v14 = vld [vmem:[#allocation7 + $0x28] sm:$0xff]  }
  0x5f   :  { %v103_v15 = vld [vmem:[#allocation2] sm:$0xf]  ;;  %v772_v16 = vld [vmem:[#allocation7 + $0x30] sm:$0xff]   ;;  %v774_v18 = vld [vmem:[#allocation8] sm:$0xff]  }
  0x60   :  { %v773_v17 = vld [vmem:[#allocation7 + $0x38] sm:$0xff]   ;;  %v775_v19 = vld [vmem:[#allocation8 + $0x8] sm:$0xff]   ;;  %v776_v20 = vld [vmem:[#allocation8 + $0x10] sm:$0xff]  }
  0x61   :  { %670 = vmatpush3.bf16.msra.mxu0 %v759_v2  ;;  %690 = vmatpush3.bf16.msra.mxu1 %v767_v6  ;;  %v777_v21 = vld [vmem:[#allocation8 + $0x18] sm:$0xff]   ;;  %v778_v22 = vld [vmem:[#allocation8 + $0x20] sm:$0xff]   ;;  %v779_v23 = vld [vmem:[#allocation8 + $0x28] sm:$0xff]  }
  0x62   :  { %671 = vmatprep.subr.bf16.mxu0 %v965_v0  ;;  %691 = vmatprep.subr.bf16.mxu1 %v965_v0  ;;  %v594_v24 = vld [vmem:[%s1174_s2] ss:$0 sm:$0xff]  ;;  %v780_v32 = vld [vmem:[#allocation8 + $0x30] sm:$0xff]   ;;  %v782_v34 = vld [vmem:[#allocation10] sm:$0xff]  }
  0x63   :  { %v781_v33 = vld [vmem:[#allocation8 + $0x38] sm:$0xff]   ;;  %v783_v35 = vld [vmem:[#allocation10 + $0x8] sm:$0xff]   ;;  %v784_v36 = vld [vmem:[#allocation10 + $0x10] sm:$0xff]  }
  0x64   :  { %v785_v37 = vld [vmem:[#allocation10 + $0x18] sm:$0xff]   ;;  %v786_v38 = vld [vmem:[#allocation10 + $0x20] sm:$0xff]   ;;  %v787_v39 = vld [vmem:[#allocation10 + $0x28] sm:$0xff]  }
  0x65   :  { %672 = vmatpush3.bf16.msra.mxu0 %v760_v3  ;;  %692 = vmatpush3.bf16.msra.mxu1 %v768_v8  ;;  %v603_v40 = vld [vmem:[%s1176_s4] ss:$0 sm:$0xff]  ;;  %v788_v48 = vld [vmem:[#allocation10 + $0x30] sm:$0xff]   ;;  %s967_s4 = smov [#allocation11]  }
  0x66   :  { %673 = vmatprep.subr.bf16.mxu0 %v965_v0  ;;  %693 = vmatprep.subr.bf16.mxu1 %v965_v0  ;;  %v789_v49 = vld [vmem:[#allocation10 + $0x38] sm:$0xff]   ;;  %s569_s17 = sshll.u32 %s967_s4, 4  ;;  %s570_s17 = int_to_ptr.vmem [resolvable:$true] %s569_s17 }
  0x67   :  { %v612_v50 = vld [vmem:[%s1178_s6] ss:$0 sm:$0xff]  ;;  %s904_s18 = scalar_lea.vmem %s570_s17, 64  ;;  %p909_p13 = scmp.lt.s32.totalorder %s570_s17, %s570_s17 }
  0x68   :  { %p905_p12 = scmp.ne.s32.totalorder %s570_s17, %s904_s18  ;;  %p910_p0 = scmp.lt.s32.totalorder %s904_s18, %s904_s18 }
  0x69   :  { %674 = vmatpush3.bf16.msra.mxu0 %v761_v5  ;;  %694 = vmatpush3.bf16.msra.mxu1 %v769_v10 }
  0x6a   :  { %675 = vmatprep.subr.bf16.mxu0 %v965_v0  ;;  %695 = vmatprep.subr.bf16.mxu1 %v965_v0  ;;  %p911_p1 = por %p910_p0, %p909_p13 }
  0x6c   :  { %p912_p2 = pnand %p911_p1, %p905_p12 }
  0x6d   :  { %676 = vmatpush3.bf16.msra.mxu0 %v762_v7  ;;  %696 = vmatpush3.bf16.msra.mxu1 %v770_v12 }
  0x6e   :  { %677 = vmatprep.subr.bf16.mxu0 %v965_v0  ;;  %697 = vmatprep.subr.bf16.mxu1 %v965_v0 }
  0x71   :  { %678 = vmatpush3.bf16.msra.mxu0 %v763_v9  ;;  %698 = vmatpush3.bf16.msra.mxu1 %v771_v14 }
  0x72   :  { %679 = vmatprep.subr.bf16.mxu0 %v965_v0  ;;  %699 = vmatprep.subr.bf16.mxu1 %v965_v0 }
  0x75   :  { %680 = vmatpush3.bf16.msra.mxu0 %v764_v11  ;;  %700 = vmatpush3.bf16.msra.mxu1 %v772_v16 }
  0x76   :  { %681 = vmatprep.subr.bf16.mxu0 %v965_v0  ;;  %701 = vmatprep.subr.bf16.mxu1 %v965_v0 }
  0x79   :  { %682 = vmatpush3.bf16.msra.mxu0 %v765_v13  ;;  %702 = vmatpush3.bf16.msra.mxu1 %v773_v17 }
  0x7a   :  { %707 = vmatprep.subr.bf16.mxu0 %v965_v0  ;;  %727 = vmatprep.subr.bf16.mxu1 %v965_v0 }
  0x7c   :  { %684 = vmatmul.mubr.bf16.vlgmr.msra.gmra.mrb[0].mxu0 %v103_v15 }
  0x7d   :  { %723 = vmatprep.mubr.msk.bf16.mxu0 %vm966_vm0, %v965_v0  ;;  %708 = vmatpush3.bf16.msra.mxu0 %v774_v18 }
  0x7e   :  { %709 = vmatprep.subr.bf16.mxu0 %v965_v0 }
  0x81   :  { %710 = vmatpush3.bf16.msra.mxu0 %v775_v19 }
  0x82   :  { %711 = vmatprep.subr.bf16.mxu0 %v965_v0 }
  0x85   :  { %712 = vmatpush3.bf16.msra.mxu0 %v776_v20 }
  0x86   :  { %713 = vmatprep.subr.bf16.mxu0 %v965_v0 }
  0x89   :  { %714 = vmatpush3.bf16.msra.mxu0 %v777_v21 }
  0x8a   :  { %715 = vmatprep.subr.bf16.mxu0 %v965_v0 }
  0x8d   :  { %716 = vmatpush3.bf16.msra.mxu0 %v778_v22 }
  0x8e   :  { %717 = vmatprep.subr.bf16.mxu0 %v965_v0 }
  0x91   :  { %718 = vmatpush3.bf16.msra.mxu0 %v779_v23 }
  0x92   :  { %719 = vmatprep.subr.bf16.mxu0 %v965_v0 }
  0x95   :  { %720 = vmatpush3.bf16.msra.mxu0 %v780_v32 }
  0x96   :  { %721 = vmatprep.subr.bf16.mxu0 %v965_v0 }
  0x99   :  { %722 = vmatpush3.bf16.msra.mxu0 %v781_v33 }
 0x14f   :  { %v209_v25 = vpop.f32.mrb[0].mxu0 }
 0x150   :  { %v210_v26 = vadd.f32 %v594_v24, %v209_v25  ;;  %v685_v27 = vpop.f32.mrb[1].mxu0 }
 0x151   :  { %v212_v28 = vpop.f32.mrb[2].mxu0 }
 0x152   :  { %v215_v29 = vmax.f32 %v210_v26, 0.0  ;;  %v686_v30 = vpop.f32.mrb[3].mxu0 }
 0x154   :  { %v216_v31 = vpack.c.bf16 %v215_v29, %v215_v29 }
 0x156   :  { %704 = vmatmul.mubr.bf16.vlgmr.msra.gmra.mrb[0].mxu1 %v216_v31 }
 0x157   :  { %743 = vmatprep.mubr.msk.bf16.mxu1 %vm966_vm0, %v965_v0  ;;  %728 = vmatpush3.bf16.msra.mxu1 %v782_v34 }
 0x158   :  { %729 = vmatprep.subr.bf16.mxu1 %v965_v0 }
 0x15b   :  { %730 = vmatpush3.bf16.msra.mxu1 %v783_v35 }
 0x15c   :  { %731 = vmatprep.subr.bf16.mxu1 %v965_v0 }
 0x15f   :  { %732 = vmatpush3.bf16.msra.mxu1 %v784_v36 }
 0x160   :  { %733 = vmatprep.subr.bf16.mxu1 %v965_v0 }
 0x163   :  { %734 = vmatpush3.bf16.msra.mxu1 %v785_v37 }
 0x164   :  { %735 = vmatprep.subr.bf16.mxu1 %v965_v0 }
 0x167   :  { %736 = vmatpush3.bf16.msra.mxu1 %v786_v38 }
 0x168   :  { %737 = vmatprep.subr.bf16.mxu1 %v965_v0 }
 0x16b   :  { %738 = vmatpush3.bf16.msra.mxu1 %v787_v39 }
 0x16c   :  { %739 = vmatprep.subr.bf16.mxu1 %v965_v0 }
 0x16f   :  { %740 = vmatpush3.bf16.msra.mxu1 %v788_v48 }
 0x170   :  { %741 = vmatprep.subr.bf16.mxu1 %v965_v0 }
 0x173   :  { %742 = vmatpush3.bf16.msra.mxu1 %v789_v49 }
 0x229   :  { %v322_v41 = vpop.f32.mrb[0].mxu1 }
 0x22a   :  { %v323_v42 = vadd.f32 %v603_v40, %v322_v41  ;;  %v705_v43 = vpop.f32.mrb[1].mxu1 }
 0x22b   :  { %v325_v44 = vpop.f32.mrb[2].mxu1 }
 0x22c   :  { %v328_v45 = vmax.f32 %v323_v42, 0.0  ;;  %v706_v46 = vpop.f32.mrb[3].mxu1 }
 0x22e   :  { %v329_v47 = vpack.c.bf16 %v328_v45, %v328_v45 }
 0x230   :  { %560 = vst [vmem:[#allocation11] sm:$0xf] %v329_v47  ;;  %724 = vmatmul.mubr.bf16.vlgmr.msra.gmra.mrb[4].mxu0 %v329_v47 }
 0x303   :  { %v435_v51 = vpop.f32.mrb[4].mxu0 }
 0x304   :  { %v436_v52 = vadd.f32 %v612_v50, %v435_v51  ;;  %v725_v53 = vpop.f32.mrb[5].mxu0 }
 0x305   :  { %v438_v54 = vpop.f32.mrb[6].mxu0 }
 0x306   :  { %v441_v55 = vmax.f32 %v436_v52, 0.0  ;;  %v726_v56 = vpop.f32.mrb[7].mxu0 }
 0x308   :  { %v442_v57 = vpack.c.bf16 %v441_v55, %v441_v55 }
 0x30a   :  { %744 = vmatmul.mubr.bf16.vlgmr.msra.gmra.mrb[4].mxu1 %v442_v57 }
 0x30b   :  { %915 = shalt.err (!%p912_p2)
}
 0x30c   :  { %s916_s14 = scalar_lea.hbm %s1181_s9, 64 }
 0x30d   :  { %p917_p3 = scmp.ne.s32.totalorder %s1181_s9, %s916_s14  ;;  %p920_p4 = scmp.lt.u32.totalorder %s916_s14, %s1181_s9 }
 0x30f   :  { %p922_p5 = pnand %p920_p4, %p917_p3 }
 0x311   :  { %925 = shalt.err (!%p922_p5)
}
 0x312   :  { %572 = dma.vmem_to_hbm [thread:$0]  %s570_s17, 64, %s1181_s9, [#allocation4]   ;;  %v621_v58 = vld [vmem:[%s1180_s8] ss:$0 sm:$0xff] }
 0x313   :  { %s968_s27 = smov [#allocation12]  }
 0x314   :  { %s579_s29 = sshll.u32 %s968_s27, 4  ;;  %s580_s29 = int_to_ptr.vmem [resolvable:$true] %s579_s29 }
 0x315   :  { %s926_s9 = scalar_lea.vmem %s580_s29, 64  ;;  %p931_p7 = scmp.lt.s32.totalorder %s580_s29, %s580_s29 }
 0x316   :  { %p927_p6 = scmp.ne.s32.totalorder %s580_s29, %s926_s9  ;;  %p932_p8 = scmp.lt.s32.totalorder %s926_s9, %s926_s9 }
 0x318   :  { %p933_p9 = por %p932_p8, %p931_p7 }
 0x31a   :  { %p934_p10 = pnand %p933_p9, %p927_p6 }
 0x3dd   :  { %v548_v59 = vpop.f32.mrb[4].mxu1 }
 0x3de   :  { %v549_v60 = vadd.f32 %v621_v58, %v548_v59  ;;  %v745_v61 = vpop.f32.mrb[5].mxu1 }
 0x3df   :  { %v551_v62 = vpop.f32.mrb[6].mxu1 }
 0x3e0   :  { %v630_v63 = vmul.f32 -1.442695, %v549_v60  ;;  %v746_v0 = vpop.f32.mrb[7].mxu1 }
 0x3e2   :  { %790 = vpow2.f32 %v630_v63 }
 0x3ec   :  { %v791_v1 = vpop.eup %790 }
 0x3ed   :  { %v557_v2 = vadd.f32 1.0, %v791_v1 }
 0x3ef   :  { %792 = vrcp.f32 %v557_v2 }
 0x3f9   :  { %v793_v3 = vpop.eup %792 }
 0x3fa   :  { %v561_v4 = vpack.c.bf16 %v793_v3, %v793_v3 }
 0x3fc   :  { %562 = vst [vmem:[#allocation12] sm:$0xf] %v561_v4 }
 0x3fd   :  { %937 = shalt.err (!%p934_p10)
}
 0x3fe   :  { %s938_s5 = scalar_lea.hbm %s1182_s10, 64 }
 0x3ff   :  { %p939_p11 = scmp.ne.s32.totalorder %s1182_s10, %s938_s5  ;;  %p942_p12 = scmp.lt.u32.totalorder %s938_s5, %s1182_s10 }
 0x401   :  { %p944_p13 = pnand %p942_p12, %p939_p11 }
 0x403   :  { %947 = shalt.err (!%p944_p13)
}
 0x404   :  { %582 = dma.vmem_to_hbm [thread:$0]  %s580_s29, 64, %s1182_s10, [#allocation13]  }
 0x405   :  { %954 = dma.done.wait [#allocation4], 64  }
 0x406   :  { %955 = vsyncadd [#allocation4], 4294967232 }
 0x407   :  { %956 = dma.done.wait [#allocation13], 64  }
 0x408   :  { %957 = vsyncadd [#allocation13], 4294967232 }
 0x409   :  { %589 = vsyncpa [#allocation3], 1 }
 0x40a   :  { %590 = vsyncpa [#allocation6], 1 }
 0x40b   :  { %591 = vsyncpa [#allocation9], 1 }
 0x40c   :  { %592 = vsyncpa [#allocation4], 1 }
 0x40d   :  { %593 = vsyncpa [#allocation13], 1 }

</bundles_post_ra>
